<compile_context>
chip_gen: v7x
topology: tpu7x:2x2x1
jax: 0.10.0
libtpu: 0.0.40
codegen_flags: <defaults>
</compile_context>

<pallas_src>
import math

import jax
import jax.numpy as jnp
from jax.experimental import pallas as pl
from jax.experimental.pallas import tpu as pltpu

TIME_DIM = 16
LANE = 128


def _round_up(x, m):
    return ((x + m - 1) // m) * m


def _psd_projection_kernel(x_ref, w_ref, b_ref, o_ref):
    # x_ref: (BB, T, S, Cp)  -- channels on the lane axis, S on sublanes
    # w_ref: (Cp, Dp)        -- pre-transposed, zero-padded linear weight
    # b_ref: (1, Dp)         -- zero-padded bias
    # o_ref: (BB, T, Dp)     -- lane-dense output (Dp multiple of 128)
    x = x_ref[...]
    m = jnp.mean(x, axis=2)                       # (BB, T, Cp): sublane reduce over S
    # exact GELU (matches torch.nn.functional.gelu default, erf form)
    g = 0.5 * m * (1.0 + jax.lax.erf(m * (1.0 / math.sqrt(2.0))))
    BB, T, Cp = g.shape
    g2 = g.reshape(BB * T, Cp)                    # fuse all batches into one MXU call
    y = jnp.dot(g2, w_ref[...], preferred_element_type=jnp.float32)  # (BB*T, Dp)
    y = y + b_ref[...]                            # broadcast bias (1, Dp)
    o_ref[...] = y.reshape(BB, T, -1).astype(o_ref.dtype)


def psd_projection_forward(x, weight, bias):
    """x: (B, C, L) float32; weight: (dim_out, dim_in); bias: (dim_out,)."""
    B, C, L = x.shape
    dim_out, dim_in = weight.shape
    assert C == dim_in
    assert L % TIME_DIM == 0
    S = L // TIME_DIM

    Cp = _round_up(C, LANE)        # lane-dense channels / aligned MXU K
    Dp = _round_up(dim_out, LANE)  # lane-dense output store

    # (B, C, T, S) -> (B, T, S, C): channels land on the lane axis, the mean
    # reduction axis (S) lands on sublanes, and the transpose(-1,-2) of the
    # PyTorch module is absorbed into the wrapper-side layout change.
    x4 = x.reshape(B, C, TIME_DIM, S).transpose(0, 2, 3, 1)

    # Batch-block size: amortize per-grid-step overhead while keeping the
    # double-buffered x block comfortably under scoped VMEM on all chips
    # (budget ~4 MiB per x buffer -> ~8 MiB double-buffered + small W/out).
    per_batch_bytes = TIME_DIM * S * Cp * 4
    BB = max(1, min(B, (4 << 20) // per_batch_bytes))
    B_pad = _round_up(B, BB)

    x4 = jnp.pad(
        x4.astype(jnp.float32),
        ((0, B_pad - B), (0, 0), (0, 0), (0, Cp - C)),
    )
    w_t = jnp.pad(weight.T.astype(jnp.float32),
                  ((0, Cp - C), (0, Dp - dim_out)))               # (Cp, Dp)
    b2 = jnp.pad(bias.astype(jnp.float32), (0, Dp - dim_out)).reshape(1, Dp)

    out = pl.pallas_call(
        _psd_projection_kernel,
        out_shape=jax.ShapeDtypeStruct((B_pad, TIME_DIM, Dp), jnp.float32),
        grid_spec=pltpu.PrefetchScalarGridSpec(
            num_scalar_prefetch=0,
            grid=(B_pad // BB,),
            in_specs=[
                pl.BlockSpec((BB, TIME_DIM, S, Cp), lambda b: (b, 0, 0, 0)),
                pl.BlockSpec((Cp, Dp), lambda b: (0, 0)),
                pl.BlockSpec((1, Dp), lambda b: (0, 0)),
            ],
            out_specs=pl.BlockSpec((BB, TIME_DIM, Dp), lambda b: (b, 0, 0)),
        ),
        compiler_params=pltpu.CompilerParams(
            dimension_semantics=("parallel",),
            vmem_limit_bytes=32 * 1024 * 1024,
        ),
    )(x4, w_t, b2)

    # Drop batch / output-channel padding.
    return out[:B, :, :dim_out].astype(x.dtype)


def psd_projection_reference(x, weight, bias):
    B, C, L = x.shape
    S = L // TIME_DIM
    xr = x.reshape(B, C, TIME_DIM, S)
    m = jnp.mean(xr, axis=3)
    g = jax.nn.gelu(m, approximate=False)
    gt = jnp.transpose(g, (0, 2, 1))
    return gt @ weight.T + bias


if __name__ == "__main__":
    # Small shapes consistent with the module: dim_in (channels) = 32,
    # dim_out = 8, time_dim = 16, sequence length L = 64 (S = 4), batch = 2.
    B, dim_in, dim_out, L = 2, 32, 8, 64

    key = jax.random.PRNGKey(0)
    kx, kw, kb = jax.random.split(key, 3)

    x = jax.random.normal(kx, (B, dim_in, L), dtype=jnp.float32)
    # Deterministic Linear init (uniform like PyTorch's default bound 1/sqrt(fan_in))
    bound = 1.0 / math.sqrt(dim_in)
    weight = jax.random.uniform(kw, (dim_out, dim_in), jnp.float32, -bound, bound)
    bias = jax.random.uniform(kb, (dim_out,), jnp.float32, -bound, bound)

    out = psd_projection_forward(x, weight, bias)
    out = jax.block_until_ready(out)

    ref = psd_projection_reference(x, weight, bias)
    assert out.shape == (B, TIME_DIM, dim_out), out.shape
    assert jnp.allclose(out, ref, atol=1e-5, rtol=1e-5), float(jnp.max(jnp.abs(out - ref)))

    print("KERNEL_OK")
</pallas_src>

<mosaic_0001>
module attributes {stable_mosaic.version = 11 : i64} {
  func.func @_psd_projection_kernel(%arg0: i32, %arg1: memref<2x16x4x128xf32, #tpu.memory_space<vmem>>, %arg2: memref<128x128xf32, #tpu.memory_space<vmem>>, %arg3: memref<1x128xf32, #tpu.memory_space<vmem>>, %arg4: memref<2x16x128xf32, #tpu.memory_space<vmem>>) attributes {dimension_semantics = [#tpu.dimension_semantics<parallel>], iteration_bounds = array<i64: 1>, scalar_prefetch = 0 : i64, scratch_operands = 0 : i64, tpu.core_type = #tpu.core_type<tc>, window_params = [{transform_indices = @transform_0, window_bounds = array<i64: 2, 16, 4, 128>}, {pipeline_mode = #tpu.pipeline_mode<synchronous>, transform_indices = @transform_1, window_bounds = array<i64: 128, 128>}, {pipeline_mode = #tpu.pipeline_mode<synchronous>, transform_indices = @transform_2, window_bounds = array<i64: 1, 128>}, {transform_indices = @transform_3, window_bounds = array<i64: 2, 16, 128>}]} {
    %c0 = arith.constant 0 : index
    %c0_0 = arith.constant 0 : index
    %c0_1 = arith.constant 0 : index
    %c0_2 = arith.constant 0 : index
    %0 = vector.load %arg1[%c0, %c0_0, %c0_1, %c0_2] : memref<2x16x4x128xf32, #tpu.memory_space<vmem>>, vector<2x16x4x128xf32>
    %cst = arith.constant dense<0.000000e+00> : vector<2x16x128xf32>
    %1 = vector.multi_reduction <add>, %0, %cst [2] : vector<2x16x4x128xf32> to vector<2x16x128xf32>
    %cst_3 = arith.constant 4.000000e+00 : f32
    %2 = vector.broadcast %cst_3 : f32 to vector<2x16x128xf32>
    %3 = arith.divf %1, %2 : vector<2x16x128xf32>
    %cst_4 = arith.constant 5.000000e-01 : f32
    %4 = vector.broadcast %cst_4 : f32 to vector<2x16x128xf32>
    %5 = arith.mulf %4, %3 : vector<2x16x128xf32>
    %cst_5 = arith.constant 0.707106769 : f32
    %6 = vector.broadcast %cst_5 : f32 to vector<2x16x128xf32>
    %7 = arith.mulf %3, %6 : vector<2x16x128xf32>
    %8 = math.erf %7 : vector<2x16x128xf32>
    %cst_6 = arith.constant 1.000000e+00 : f32
    %9 = vector.broadcast %cst_6 : f32 to vector<2x16x128xf32>
    %10 = arith.addf %9, %8 : vector<2x16x128xf32>
    %11 = arith.mulf %5, %10 : vector<2x16x128xf32>
    %12 = vector.shape_cast %11 : vector<2x16x128xf32> to vector<32x128xf32>
    %c0_7 = arith.constant 0 : index
    %c0_8 = arith.constant 0 : index
    %13 = vector.load %arg2[%c0_7, %c0_8] : memref<128x128xf32, #tpu.memory_space<vmem>>, vector<128x128xf32>
    %cst_9 = arith.constant dense<0.000000e+00> : vector<32x128xf32>
    %14 = tpu.matmul %12, %13, %cst_9 {dimension_numbers = #tpu.dot_dimension_numbers<[1], [0], [0], [1], [0, 0, 1, 1], [], []>} : vector<32x128xf32>, vector<128x128xf32>, vector<32x128xf32> -> vector<32x128xf32>
    %c0_10 = arith.constant 0 : index
    %c0_11 = arith.constant 0 : index
    %15 = vector.load %arg3[%c0_10, %c0_11] : memref<1x128xf32, #tpu.memory_space<vmem>>, vector<1x128xf32>
    %16 = vector.broadcast %15 : vector<1x128xf32> to vector<32x128xf32>
    %17 = arith.addf %14, %16 : vector<32x128xf32>
    %18 = vector.shape_cast %17 : vector<32x128xf32> to vector<2x16x128xf32>
    %c0_12 = arith.constant 0 : index
    %c0_13 = arith.constant 0 : index
    %c0_14 = arith.constant 0 : index
    %19 = vector.load %arg4[%c0_12, %c0_13, %c0_14] : memref<2x16x128xf32, #tpu.memory_space<vmem>>, vector<2x16x128xf32>
    tpu.vector_store %arg4[%c0_12, %c0_13, %c0_14], %18 {strides = array<i32>} : memref<2x16x128xf32, #tpu.memory_space<vmem>>, vector<2x16x128xf32>,
    return
  }
  func.func @transform_0(%arg0: i32) -> (i32, i32, i32, i32) {
    %c0_i32 = arith.constant 0 : i32
    %c0_i32_0 = arith.constant 0 : i32
    %c0_i32_1 = arith.constant 0 : i32
    %c0_i32_2 = arith.constant 0 : i32
    return %arg0, %c0_i32, %c0_i32_0, %c0_i32_1 : i32, i32, i32, i32
  }
  func.func @transform_1(%arg0: i32) -> (i32, i32) {
    %c0_i32 = arith.constant 0 : i32
    %c0_i32_0 = arith.constant 0 : i32
    %c0_i32_1 = arith.constant 0 : i32
    return %c0_i32, %c0_i32_0 : i32, i32
  }
  func.func @transform_2(%arg0: i32) -> (i32, i32) {
    %c0_i32 = arith.constant 0 : i32
    %c0_i32_0 = arith.constant 0 : i32
    %c0_i32_1 = arith.constant 0 : i32
    return %c0_i32, %c0_i32_0 : i32, i32
  }
  func.func @transform_3(%arg0: i32) -> (i32, i32, i32) {
    %c0_i32 = arith.constant 0 : i32
    %c0_i32_0 = arith.constant 0 : i32
    %c0_i32_1 = arith.constant 0 : i32
    return %arg0, %c0_i32, %c0_i32_0 : i32, i32, i32
  }
}

</mosaic_0001>

<bundles_post_ra>
// kernel: tpu_custom_call.1
= control target key start
LH: loop header
LB: loop body
LE: loop exit
PB: predicated region body
PF: predicated region fallthrough
CT: control target
= control target key end

     0   :  { %8 = vsyncpa [#allocation3], 0  ;;  %s1166_s0 = inlined_call_operand.hbm [shape: f32[2,16,4,128], index: 0, kind: input, shape index: {}]   ;;  %s1167_s1 = inlined_call_operand.hbm [shape: f32[128,128], index: 1, kind: input, shape index: {}]   ;;  %s1168_s2 = inlined_call_operand.vmem [shape: f32[1,128], index: 2, kind: input, shape index: {}]   ;;  %s1169_s3 = inlined_call_operand.hbm [shape: f32[2,16,128], index: 3, kind: output, shape index: {}]  }
   0x1   :  { %9 = vsyncpa [#allocation6], 0 }
   0x2   :  { %10 = vsyncpa [#allocation4], 0  ;;  %s944_s12 = smov [#allocation2]   ;;  %s872_s16 = scalar_lea.hbm %s1166_s0, 2048 }
   0x3   :  { %s16_s13 = sshll.u32 %s944_s12, 4  ;;  %p873_p0 = scmp.ne.s32.totalorder %s1166_s0, %s872_s16  ;;  %s17_s13 = int_to_ptr.vmem [resolvable:$true] %s16_s13 }
   0x4   :  { %p876_p1 = scmp.lt.u32.totalorder %s872_s16, %s1166_s0 }
   0x6   :  { %p878_p2 = pnand %p876_p1, %p873_p0 }
   0x8   :  { %881 = shalt.err (!%p878_p2)
}
   0x9   :  { %s882_s21 = scalar_lea.vmem %s17_s13, 2048  ;;  %p887_p4 = scmp.lt.s32.totalorder %s17_s13, %s17_s13 }
   0xa   :  { %p883_p3 = scmp.ne.s32.totalorder %s17_s13, %s882_s21  ;;  %p888_p5 = scmp.lt.s32.totalorder %s882_s21, %s882_s21 }
   0xc   :  { %p889_p6 = por %p888_p5, %p887_p4 }
   0xe   :  { %p890_p7 = pnand %p889_p6, %p883_p3 }
  0x10   :  { %893 = shalt.err (!%p890_p7)
}
  0x11   :  { %s945_s22 = smov 64   ;;  %s946_s23 = smov 4  }
  0x12   :  { %22 = dma.hbm_to_vmem [thread:$0]  %s1166_s0, 2048, %s17_s13, [#allocation3], %s945_s22, %s945_s22, %s946_s23  }
  0x13   :  { %s947_s26 = smov [#allocation5]   ;;  %s894_s30 = scalar_lea.hbm %s1167_s1, 2048 }
  0x14   :  { %s28_s27 = sshll.u32 %s947_s26, 4  ;;  %p895_p8 = scmp.ne.s32.totalorder %s1167_s1, %s894_s30  ;;  %s29_s27 = int_to_ptr.vmem [resolvable:$true] %s28_s27 }
  0x15   :  { %p898_p9 = scmp.lt.u32.totalorder %s894_s30, %s1167_s1 }
  0x17   :  { %p900_p10 = pnand %p898_p9, %p895_p8 }
  0x19   :  { %903 = shalt.err (!%p900_p10)
}
  0x1a   :  { %s904_s8 = scalar_lea.vmem %s29_s27, 2048  ;;  %p909_p12 = scmp.lt.s32.totalorder %s29_s27, %s29_s27 }
  0x1b   :  { %p905_p11 = scmp.ne.s32.totalorder %s29_s27, %s904_s8  ;;  %p910_p13 = scmp.lt.s32.totalorder %s904_s8, %s904_s8 }
  0x1d   :  { %p911_p0 = por %p910_p13, %p909_p12 }
  0x1f   :  { %p912_p1 = pnand %p911_p0, %p905_p11 }
  0x21   :  { %915 = shalt.err (!%p912_p1)
}
  0x22   :  { %s948_s0 = smov 128   ;;  %s949_s9 = smov 8  }
  0x23   :  { %34 = dma.hbm_to_vmem [thread:$0]  %s1167_s1, 2048, %s29_s27, [#allocation6], %s948_s0, %s948_s0, %s949_s9  }
  0x24   :  { %938 = dma.done.wait [#allocation3], 2048  }
  0x25   :  { %939 = vsyncadd [#allocation3], 4294965248 }
  0x26   :  { %940 = dma.done.wait [#allocation6], 2048  }
  0x27   :  { %941 = vsyncadd [#allocation6], 4294965248  ;;  %v493_v0 = vld [vmem:[#allocation5] sm:$0xff]  ;;  %v494_v1 = vld [vmem:[#allocation5 + $0x8] sm:$0xff]  ;;  %vm75_vm0 = vcmask 1043456   ;;  %vm548_vm1 = vcmask 1041409  }
  0x28   :  { %v495_v2 = vld [vmem:[#allocation5 + $0x10] sm:$0xff]  ;;  %v753_v3 = vpack.c.bf16 %v494_v1, %v493_v0  ;;  %v496_v4 = vld [vmem:[#allocation5 + $0x18] sm:$0xff]  ;;  %v497_v5 = vld [vmem:[#allocation5 + $0x20] sm:$0xff]  ;;  %vm550_vm2 = vcmask 1042434   ;;  %vm552_vm3 = vcmask 1043459   ;;  %vm554_vm4 = vcmask 1044484  }
  0x29   :  { %v757_v6 = vpack.c.bf16 %v496_v4, %v495_v2  ;;  %v498_v7 = vld [vmem:[#allocation5 + $0x28] sm:$0xff]  ;;  %v499_v8 = vld [vmem:[#allocation5 + $0x30] sm:$0xff]  ;;  %v500_v9 = vld [vmem:[#allocation5 + $0x38] sm:$0xff]  ;;  %vm556_vm5 = vcmask 1045509   ;;  %vm558_vm6 = vcmask 1046534   ;;  %vm560_vm7 = vcmask 1047559  }
  0x2a   :  { %754 = vmatprep.subr.bf16.mxu0 %v753_v3  ;;  %785 = vmatprep.subr.bf16.mxu1 %v753_v3  ;;  %v501_v10 = vld [vmem:[#allocation5 + $0x40] sm:$0xff]  ;;  %v502_v11 = vld [vmem:[#allocation5 + $0x48] sm:$0xff]  ;;  %v503_v12 = vld [vmem:[#allocation5 + $0x50] sm:$0xff]  ;;  %v761_v16 = vpack.c.bf16 %v498_v7, %v497_v5  ;;  %v765_v22 = vpack.c.bf16 %v500_v9, %v499_v8  ;;  %s950_s13 = smov [#allocation7]  }
  0x2b   :  { %756 = vmatpush3.bf16.msra.mxu0 %v753_v3  ;;  %793 = vmatpush3.bf16.msra.mxu1 %v753_v3  ;;  %v504_v13 = vld [vmem:[#allocation5 + $0x58] sm:$0xff]  ;;  %v505_v14 = vld [vmem:[#allocation5 + $0x60] sm:$0xff]  ;;  %v506_v15 = vld [vmem:[#allocation5 + $0x68] sm:$0xff]  ;;  %v998_v23 = vpack.c.bf16 %v502_v11, %v501_v10  ;;  %s681_s14 = sshll.u32 %s950_s13, 4  ;;  %s682_s14 = int_to_ptr.vmem [resolvable:$true] %s681_s14 }
  0x2c   :  { %758 = vmatprep.subr.bf16.mxu0 %v757_v6  ;;  %786 = vmatprep.subr.bf16.mxu1 %v757_v6  ;;  %v43_v17 = vld [vmem:[#allocation2] sm:$0xf]  ;;  %v44_v18 = vld [vmem:[#allocation2 + $0x4] sm:$0xf]  ;;  %v45_v19 = vld [vmem:[#allocation2 + $0x8] sm:$0xf]  ;;  %v1000_v24 = vpack.c.bf16 %v504_v13, %v503_v12  ;;  %v1002_v25 = vpack.c.bf16 %v506_v15, %v505_v14  ;;  %p921_p3 = scmp.lt.s32.totalorder %s682_s14, %s682_s14 }
  0x2d   :  { %v46_v20 = vld [vmem:[#allocation2 + $0xc] sm:$0xf]  ;;  %v47_v21 = vld [vmem:[#allocation2 + $0x10] sm:$0xf]  ;;  %v48_v26 = vld [vmem:[#allocation2 + $0x14] sm:$0xf] }
  0x2e   :  { %v49_v27 = vld [vmem:[#allocation2 + $0x18] sm:$0xf]  ;;  %v50_v28 = vld [vmem:[#allocation2 + $0x1c] sm:$0xf]  ;;  %v76_v29 = vsel %vm75_vm0, %v43_v17, 0.0  ;;  %v83_v30 = vsel %vm75_vm0, %v44_v18, 0.0 }
  0x2f   :  { %760 = vmatpush3.bf16.msra.mxu0 %v757_v6  ;;  %794 = vmatpush3.bf16.msra.mxu1 %v757_v6  ;;  %v90_v31 = vsel %vm75_vm0, %v45_v19, 0.0  ;;  %v97_v32 = vsel %vm75_vm0, %v46_v20, 0.0  ;;  %v77_v33 = vrot.slane %v76_v29, 4  ;;  %v84_v34 = vrot.slane %v83_v30, 4  ;;  %s916_s15 = scalar_lea.vmem %s682_s14, 512 }
  0x30   :  { %762 = vmatprep.subr.bf16.mxu0 %v761_v16  ;;  %787 = vmatprep.subr.bf16.mxu1 %v761_v16  ;;  %v91_v35 = vrot.slane %v90_v31, 4  ;;  %v98_v36 = vrot.slane %v97_v32, 4  ;;  %v104_v37 = vsel %vm75_vm0, %v47_v21, 0.0  ;;  %v111_v38 = vsel %vm75_vm0, %v48_v26, 0.0  ;;  %v507_v21 = vld [vmem:[#allocation5 + $0x70] sm:$0xff]  ;;  %p917_p2 = scmp.ne.s32.totalorder %s682_s14, %s916_s15  ;;  %p922_p4 = scmp.lt.s32.totalorder %s916_s15, %s916_s15 }
  0x31   :  { %v118_v39 = vsel %vm75_vm0, %v49_v27, 0.0  ;;  %v125_v40 = vsel %vm75_vm0, %v50_v28, 0.0  ;;  %v78_v41 = vadd.f32 %v77_v33, %v76_v29  ;;  %v85_v42 = vadd.f32 %v84_v34, %v83_v30  ;;  %v59_v33 = vld [vmem:[#allocation2 + $0x40] sm:$0xf] }
  0x32   :  { %v92_v43 = vadd.f32 %v91_v35, %v90_v31  ;;  %v99_v44 = vadd.f32 %v98_v36, %v97_v32  ;;  %v105_v45 = vrot.slane %v104_v37, 4  ;;  %v112_v46 = vrot.slane %v111_v38, 4  ;;  %p923_p5 = por %p922_p4, %p921_p3 }
  0x33   :  { %764 = vmatpush3.bf16.msra.mxu0 %v761_v16  ;;  %795 = vmatpush3.bf16.msra.mxu1 %v761_v16  ;;  %v119_v47 = vrot.slane %v118_v39, 4  ;;  %v126_v48 = vrot.slane %v125_v40, 4  ;;  %v79_v49 = vrot.slane %v78_v41, 2  ;;  %v86_v50 = vrot.slane %v85_v42, 2 }
  0x34   :  { %766 = vmatprep.subr.bf16.mxu0 %v765_v22  ;;  %788 = vmatprep.subr.bf16.mxu1 %v765_v22  ;;  %v93_v51 = vrot.slane %v92_v43, 2  ;;  %v100_v52 = vrot.slane %v99_v44, 2  ;;  %v106_v53 = vadd.f32 %v105_v45, %v104_v37  ;;  %v113_v54 = vadd.f32 %v112_v46, %v111_v38  ;;  %v60_v38 = vld [vmem:[#allocation2 + $0x44] sm:$0xf]  ;;  %p924_p6 = pnand %p923_p5, %p917_p2 }
  0x35   :  { %v120_v55 = vadd.f32 %v119_v47, %v118_v39  ;;  %v127_v56 = vadd.f32 %v126_v48, %v125_v40  ;;  %v80_v57 = vadd.f32 %v79_v49, %v78_v41  ;;  %v87_v58 = vadd.f32 %v86_v50, %v85_v42  ;;  %v61_v39 = vld [vmem:[#allocation2 + $0x48] sm:$0xf]  ;;  %v63_v48 = vld [vmem:[#allocation2 + $0x50] sm:$0xf] }
  0x36   :  { %v94_v59 = vadd.f32 %v93_v51, %v92_v43  ;;  %v101_v60 = vadd.f32 %v100_v52, %v99_v44  ;;  %v107_v61 = vrot.slane %v106_v53, 2  ;;  %v114_v62 = vrot.slane %v113_v54, 2  ;;  %v62_v44 = vld [vmem:[#allocation2 + $0x4c] sm:$0xf] }
  0x37   :  { %768 = vmatpush3.bf16.msra.mxu0 %v765_v22  ;;  %796 = vmatpush3.bf16.msra.mxu1 %v765_v22  ;;  %v121_v63 = vrot.slane %v120_v55, 2  ;;  %v128_v0 = vrot.slane %v127_v56, 2  ;;  %v81_v1 = vrot.slane %v80_v57, 1  ;;  %v88_v2 = vrot.slane %v87_v58, 1  ;;  %v508_v22 = vld [vmem:[#allocation5 + $0x78] sm:$0xff] }
  0x38   :  { %770 = vmatprep.subr.bf16.mxu0 %v998_v23  ;;  %789 = vmatprep.subr.bf16.mxu1 %v998_v23  ;;  %v95_v3 = vrot.slane %v94_v59, 1  ;;  %v102_v4 = vrot.slane %v101_v60, 1  ;;  %v108_v5 = vadd.f32 %v107_v61, %v106_v53  ;;  %v115_v6 = vadd.f32 %v114_v62, %v113_v54 }
  0x39   :  { %v122_v7 = vadd.f32 %v121_v63, %v120_v55  ;;  %v129_v8 = vadd.f32 %v128_v0, %v127_v56  ;;  %v82_v9 = vadd.f32 %v81_v1, %v80_v57  ;;  %v89_v10 = vadd.f32 %v88_v2, %v87_v58  ;;  %v64_v58 = vld [vmem:[#allocation2 + $0x54] sm:$0xf]  ;;  %v65_v0 = vld [vmem:[#allocation2 + $0x58] sm:$0xf] }
  0x3a   :  { %v96_v11 = vadd.f32 %v95_v3, %v94_v59  ;;  %v103_v12 = vadd.f32 %v102_v4, %v101_v60  ;;  %v109_v13 = vrot.slane %v108_v5, 1  ;;  %v116_v14 = vrot.slane %v115_v6, 1 }
  0x3b   :  { %772 = vmatpush3.bf16.msra.mxu0 %v998_v23  ;;  %797 = vmatpush3.bf16.msra.mxu1 %v998_v23  ;;  %v123_v15 = vrot.slane %v122_v7, 1  ;;  %v130_v16 = vrot.slane %v129_v8, 1  ;;  %v301_v17 = vmul.f32 0.25, %v82_v9  ;;  %v302_v18 = vmul.f32 0.25, %v89_v10 }
  0x3c   :  { %774 = vmatprep.subr.bf16.mxu0 %v1000_v24  ;;  %790 = vmatprep.subr.bf16.mxu1 %v1000_v24  ;;  %v303_v19 = vmul.f32 0.25, %v96_v11  ;;  %v304_v20 = vmul.f32 0.25, %v103_v12  ;;  %v110_v26 = vadd.f32 %v109_v13, %v108_v5  ;;  %v117_v27 = vadd.f32 %v116_v14, %v115_v6 }
  0x3d   :  { %v124_v28 = vadd.f32 %v123_v15, %v122_v7  ;;  %v131_v29 = vadd.f32 %v130_v16, %v129_v8  ;;  %v1018_v30 = vmul.f32 0.5, %v301_v17  ;;  %v1020_v23 = vmul.f32 0.5, %v302_v18  ;;  %v66_v7 = vld [vmem:[#allocation2 + $0x5c] sm:$0xf] }
  0x3e   :  { %v1022_v31 = vmul.f32 0.5, %v303_v19  ;;  %v1024_v32 = vmul.f32 0.5, %v304_v20  ;;  %v305_v34 = vmul.f32 0.25, %v110_v26  ;;  %v306_v35 = vmul.f32 0.25, %v117_v27 }
  0x3f   :  { %776 = vmatpush3.bf16.msra.mxu0 %v1000_v24  ;;  %798 = vmatpush3.bf16.msra.mxu1 %v1000_v24  ;;  %v307_v36 = vmul.f32 0.25, %v124_v28  ;;  %v308_v37 = vmul.f32 0.25, %v131_v29  ;;  %v781_v40 = vpack.c.bf16 %v508_v22, %v507_v21  ;;  %v365_v41 = vmul.f32 0.70710677, %v301_v17 }
  0x40   :  { %778 = vmatprep.subr.bf16.mxu0 %v1002_v25  ;;  %791 = vmatprep.subr.bf16.mxu1 %v1002_v25  ;;  %v366_v42 = vmul.f32 0.70710677, %v302_v18  ;;  %v367_v43 = vmul.f32 0.70710677, %v303_v19  ;;  %v1030_v45 = vmul.f32 0.5, %v305_v34  ;;  %v1032_v46 = vmul.f32 0.5, %v306_v35 }
  0x41   :  { %v1034_v24 = vmul.f32 0.5, %v307_v36  ;;  %v1036_v47 = vmul.f32 0.5, %v308_v37  ;;  %v368_v49 = vmul.f32 0.70710677, %v304_v20  ;;  %v369_v50 = vmul.f32 0.70710677, %v305_v34 }
  0x42   :  { %v370_v51 = vmul.f32 0.70710677, %v306_v35  ;;  %808 = verf.f32 %v365_v41  ;;  %v371_v52 = vmul.f32 0.70710677, %v307_v36  ;;  %v372_v53 = vmul.f32 0.70710677, %v308_v37 }
  0x43   :  { %780 = vmatpush3.bf16.msra.mxu0 %v1002_v25  ;;  %799 = vmatpush3.bf16.msra.mxu1 %v1002_v25  ;;  %810 = verf.f32 %v366_v42  ;;  %v188_v54 = vsel %vm75_vm0, %v59_v33, 0.0  ;;  %v195_v56 = vsel %vm75_vm0, %v60_v38, 0.0  ;;  %v202_v57 = vsel %vm75_vm0, %v61_v39, 0.0 }
  0x44   :  { %782 = vmatprep.subr.bf16.mxu0 %v781_v40  ;;  %792 = vmatprep.subr.bf16.mxu1 %v781_v40  ;;  %812 = verf.f32 %v367_v43  ;;  %v189_v55 = vrot.slane %v188_v54, 4  ;;  %v196_v59 = vrot.slane %v195_v56, 4  ;;  %v203_v60 = vrot.slane %v202_v57, 4 }
  0x45   :  { %814 = verf.f32 %v368_v49  ;;  %v209_v61 = vsel %vm75_vm0, %v62_v44, 0.0  ;;  %v216_v63 = vsel %vm75_vm0, %v63_v48, 0.0  ;;  %v223_v6 = vsel %vm75_vm0, %v64_v58, 0.0 }
  0x46   :  { %816 = verf.f32 %v369_v50  ;;  %v190_v25 = vadd.f32 %v189_v55, %v188_v54  ;;  %v210_v62 = vrot.slane %v209_v61, 4  ;;  %v197_v1 = vadd.f32 %v196_v59, %v195_v56 }
  0x47   :  { %784 = vmatpush3.bf16.msra.mxu0 %v781_v40  ;;  %800 = vmatpush3.bf16.msra.mxu1 %v781_v40  ;;  %818 = verf.f32 %v370_v51  ;;  %v204_v2 = vadd.f32 %v203_v60, %v202_v57  ;;  %v217_v3 = vrot.slane %v216_v63, 4  ;;  %v224_v13 = vrot.slane %v223_v6, 4 }
  0x48   :  { %820 = verf.f32 %v371_v52  ;;  %v191_v4 = vrot.slane %v190_v25, 2  ;;  %v211_v5 = vadd.f32 %v210_v62, %v209_v61  ;;  %v198_v8 = vrot.slane %v197_v1, 2 }
  0x49   :  { %822 = verf.f32 %v372_v53  ;;  %v205_v9 = vrot.slane %v204_v2, 2  ;;  %v218_v10 = vadd.f32 %v217_v3, %v216_v63  ;;  %v230_v14 = vsel %vm75_vm0, %v65_v0, 0.0 }
  0x4a   :  { %v192_v11 = vadd.f32 %v191_v4, %v190_v25  ;;  %v212_v12 = vrot.slane %v211_v5, 2  ;;  %v199_v15 = vadd.f32 %v198_v8, %v197_v1  ;;  %v231_v18 = vrot.slane %v230_v14, 4 }
  0x4b   :  { %v206_v16 = vadd.f32 %v205_v9, %v204_v2  ;;  %v219_v17 = vrot.slane %v218_v10, 2  ;;  %v225_v22 = vadd.f32 %v224_v13, %v223_v6  ;;  %v237_v26 = vsel %vm75_vm0, %v66_v7, 0.0 }
  0x4c   :  { %v809_v19 = vpop.eup %808  ;;  %v193_v20 = vrot.slane %v192_v11, 1  ;;  %v213_v21 = vadd.f32 %v212_v12, %v211_v5  ;;  %v200_v29 = vrot.slane %v199_v15, 1  ;;  %v232_v57 = vadd.f32 %v231_v18, %v230_v14 }
  0x4d   :  { %v811_v27 = vpop.eup %810  ;;  %v429_v28 = vadd.f32 1.0, %v809_v19  ;;  %v207_v33 = vrot.slane %v206_v16, 1  ;;  %v220_v34 = vadd.f32 %v219_v17, %v218_v10  ;;  %v226_v39 = vrot.slane %v225_v22, 2  ;;  %v51_v19 = vld [vmem:[#allocation2 + $0x20] sm:$0xf] }
  0x4e   :  { %v813_v35 = vpop.eup %812  ;;  %v430_v36 = vadd.f32 1.0, %v811_v27  ;;  %v194_v37 = vadd.f32 %v193_v20, %v192_v11  ;;  %v214_v38 = vrot.slane %v213_v21, 1  ;;  %v201_v43 = vadd.f32 %v200_v29, %v199_v15  ;;  %v52_v27 = vld [vmem:[#allocation2 + $0x24] sm:$0xf] }
  0x4f   :  { %v815_v40 = vpop.eup %814  ;;  %v431_v41 = vadd.f32 1.0, %v813_v35  ;;  %v461_v42 = vmul.f32 %v429_v28, %v1018_v30  ;;  %v208_v44 = vadd.f32 %v207_v33, %v206_v16  ;;  %v221_v52 = vrot.slane %v220_v34, 1  ;;  %v53_v28 = vld [vmem:[#allocation2 + $0x28] sm:$0xf] }
  0x50   :  { %v817_v48 = vpop.eup %816  ;;  %v432_v49 = vadd.f32 1.0, %v815_v40  ;;  %v462_v50 = vmul.f32 %v430_v36, %v1020_v23  ;;  %v215_v51 = vadd.f32 %v214_v38, %v213_v21  ;;  %v227_v56 = vadd.f32 %v226_v39, %v225_v22  ;;  %v54_v39 = vld [vmem:[#allocation2 + $0x2c] sm:$0xf] }
  0x51   :  { %v819_v53 = vpop.eup %818  ;;  %v433_v54 = vadd.f32 1.0, %v817_v48  ;;  %v463_v55 = vmul.f32 %v431_v41, %v1022_v31  ;;  %v222_v61 = vadd.f32 %v221_v52, %v220_v34  ;;  %v233_v3 = vrot.slane %v232_v57, 2 }
  0x52   :  { %v821_v58 = vpop.eup %820  ;;  %v434_v59 = vadd.f32 1.0, %v819_v53  ;;  %v464_v60 = vmul.f32 %v432_v49, %v1024_v32  ;;  %v549_v30 = vsel %vm548_vm1, %v462_v50, %v461_v42  ;;  %v228_v0 = vrot.slane %v227_v56, 1  ;;  %v55_v49 = vld [vmem:[#allocation2 + $0x30] sm:$0xf] }
  0x53   :  { %v823_v25 = vpop.eup %822  ;;  %v435_v62 = vadd.f32 1.0, %v821_v58  ;;  %v465_v63 = vmul.f32 %v433_v54, %v1030_v45  ;;  %v551_v23 = vsel %vm550_vm2, %v463_v55, %v549_v30  ;;  %v238_v6 = vrot.slane %v237_v26, 4  ;;  %v57_v30 = vld [vmem:[#allocation2 + $0x38] sm:$0xf] }
  0x54   :  { %v436_v1 = vadd.f32 1.0, %v823_v25  ;;  %v466_v2 = vmul.f32 %v434_v59, %v1032_v46  ;;  %v553_v31 = vsel %vm552_vm3, %v464_v60, %v551_v23  ;;  %v229_v5 = vadd.f32 %v228_v0, %v227_v56  ;;  %v56_v60 = vld [vmem:[#allocation2 + $0x34] sm:$0xf] }
  0x55   :  { %v467_v4 = vmul.f32 %v435_v62, %v1034_v24  ;;  %v555_v32 = vsel %vm554_vm4, %v465_v63, %v553_v31  ;;  %v234_v45 = vadd.f32 %v233_v3, %v232_v57  ;;  %v317_v9 = vmul.f32 0.25, %v194_v37 }
  0x56   :  { %v468_v7 = vmul.f32 %v436_v1, %v1036_v47  ;;  %v557_v8 = vsel %vm556_vm5, %v466_v2, %v555_v32  ;;  %v239_v11 = vadd.f32 %v238_v6, %v237_v26  ;;  %v318_v12 = vmul.f32 0.25, %v201_v43  ;;  %v58_v1 = vld [vmem:[#allocation2 + $0x3c] sm:$0xf] }
  0x57   :  { %v559_v10 = vsel %vm558_vm6, %v467_v4, %v557_v8  ;;  %v319_v46 = vmul.f32 0.25, %v208_v44  ;;  %v235_v14 = vrot.slane %v234_v45, 1  ;;  %v320_v15 = vmul.f32 0.25, %v215_v51 }
  0x58   :  { %v561_v13 = vsel %vm560_vm7, %v468_v7, %v559_v10  ;;  %v321_v24 = vmul.f32 0.25, %v222_v61  ;;  %v240_v16 = vrot.slane %v239_v11, 2  ;;  %v322_v17 = vmul.f32 0.25, %v229_v5 }
  0x59   :  { %747 = vmatprep.mubr.f32.mxu0 %v561_v13  ;;  %v1063_v18 = vmul.f32 0.5, %v317_v9  ;;  %v1065_v47 = vmul.f32 0.5, %v318_v12  ;;  %v236_v20 = vadd.f32 %v235_v14, %v234_v45  ;;  %v1067_v21 = vmul.f32 0.5, %v319_v46 }
  0x5a   :  { %v1069_v22 = vmul.f32 0.5, %v320_v15  ;;  %v1071_v26 = vmul.f32 0.5, %v321_v24  ;;  %v241_v29 = vadd.f32 %v240_v16, %v239_v11  ;;  %v1073_v33 = vmul.f32 0.5, %v322_v17 }
  0x5b   :  { %v381_v34 = vmul.f32 0.70710677, %v317_v9  ;;  %v382_v35 = vmul.f32 0.70710677, %v318_v12  ;;  %v323_v36 = vmul.f32 0.25, %v236_v20  ;;  %v132_v40 = vsel %vm75_vm0, %v51_v19, 0.0 }
  0x5c   :  { %v383_v37 = vmul.f32 0.70710677, %v319_v46  ;;  %v384_v38 = vmul.f32 0.70710677, %v320_v15  ;;  %v242_v41 = vrot.slane %v241_v29, 1  ;;  %v133_v50 = vrot.slane %v132_v40, 4 }
  0x5d   :  { %v385_v42 = vmul.f32 0.70710677, %v321_v24  ;;  %v386_v43 = vmul.f32 0.70710677, %v322_v17  ;;  %824 = verf.f32 %v381_v34  ;;  %v1076_v44 = vmul.f32 0.5, %v323_v36 }
  0x5e   :  { %v387_v48 = vmul.f32 0.70710677, %v323_v36  ;;  %826 = verf.f32 %v382_v35  ;;  %v243_v51 = vadd.f32 %v242_v41, %v241_v29  ;;  %v139_v52 = vsel %vm75_vm0, %v52_v27, 0.0 }
  0x5f   :  { %828 = verf.f32 %v383_v37  ;;  %v146_v53 = vsel %vm75_vm0, %v53_v28, 0.0  ;;  %v134_v54 = vadd.f32 %v133_v50, %v132_v40  ;;  %v140_v55 = vrot.slane %v139_v52, 4 }
  0x60   :  { %830 = verf.f32 %v384_v38  ;;  %v147_v56 = vrot.slane %v146_v53, 4  ;;  %v324_v57 = vmul.f32 0.25, %v243_v51  ;;  %v153_v58 = vsel %vm75_vm0, %v54_v39, 0.0 }
  0x61   :  { %832 = verf.f32 %v385_v42  ;;  %v160_v59 = vsel %vm75_vm0, %v55_v49, 0.0  ;;  %v135_v61 = vrot.slane %v134_v54, 2  ;;  %v141_v25 = vadd.f32 %v140_v55, %v139_v52 }
  0x62   :  { %834 = verf.f32 %v386_v43  ;;  %v148_v62 = vadd.f32 %v147_v56, %v146_v53  ;;  %v1082_v63 = vmul.f32 0.5, %v324_v57  ;;  %v388_v23 = vmul.f32 0.70710677, %v324_v57 }
  0x63   :  { %836 = verf.f32 %v387_v48  ;;  %v154_v0 = vrot.slane %v153_v58, 4  ;;  %v136_v2 = vadd.f32 %v135_v61, %v134_v54  ;;  %v142_v31 = vrot.slane %v141_v25, 2 }
  0x64   :  { %v149_v3 = vrot.slane %v148_v62, 2  ;;  %v161_v4 = vrot.slane %v160_v59, 4  ;;  %838 = verf.f32 %v388_v23  ;;  %v167_v5 = vsel %vm75_vm0, %v56_v60, 0.0 }
  0x65   :  { %v155_v32 = vadd.f32 %v154_v0, %v153_v58  ;;  %v174_v6 = vsel %vm75_vm0, %v57_v30, 0.0  ;;  %v137_v7 = vrot.slane %v136_v2, 1  ;;  %v143_v8 = vadd.f32 %v142_v31, %v141_v25 }
  0x66   :  { %v150_v45 = vadd.f32 %v149_v3, %v148_v62  ;;  %v162_v9 = vadd.f32 %v161_v4, %v160_v59  ;;  %v168_v12 = vrot.slane %v167_v5, 4  ;;  %v175_v46 = vrot.slane %v174_v6, 4 }
  0x67   :  { %v825_v10 = vpop.eup %824  ;;  %v156_v11 = vrot.slane %v155_v32, 2  ;;  %v181_v13 = vsel %vm75_vm0, %v58_v1, 0.0  ;;  %v138_v24 = vadd.f32 %v137_v7, %v136_v2  ;;  %v144_v16 = vrot.slane %v143_v8, 1 }
  0x68   :  { %v827_v14 = vpop.eup %826  ;;  %v445_v15 = vadd.f32 1.0, %v825_v10  ;;  %v151_v17 = vrot.slane %v150_v45, 1  ;;  %v163_v28 = vrot.slane %v162_v9, 2  ;;  %v169_v29 = vadd.f32 %v168_v12, %v167_v5 }
  0x69   :  { %v829_v19 = vpop.eup %828  ;;  %v446_v20 = vadd.f32 1.0, %v827_v14  ;;  %v157_v27 = vadd.f32 %v156_v11, %v155_v32  ;;  %v145_v37 = vadd.f32 %v144_v16, %v143_v8  ;;  %v176_v52 = vadd.f32 %v175_v46, %v174_v6 }
  0x6a   :  { %v831_v34 = vpop.eup %830  ;;  %v447_v35 = vadd.f32 1.0, %v829_v19  ;;  %v477_v36 = vmul.f32 %v445_v15, %v1063_v18  ;;  %v152_v38 = vadd.f32 %v151_v17, %v150_v45  ;;  %v164_v43 = vadd.f32 %v163_v28, %v162_v9  ;;  %v68_v15 = vld [vmem:[#allocation2 + $0x64] sm:$0xf] }
  0x6b   :  { %v833_v39 = vpop.eup %832  ;;  %v448_v40 = vadd.f32 1.0, %v831_v34  ;;  %v478_v41 = vmul.f32 %v446_v20, %v1065_v47  ;;  %v158_v42 = vrot.slane %v157_v27, 1  ;;  %v170_v51 = vrot.slane %v169_v29, 2  ;;  %v70_v34 = vld [vmem:[#allocation2 + $0x6c] sm:$0xf] }
  0x6c   :  { %v835_v48 = vpop.eup %834  ;;  %v449_v49 = vadd.f32 1.0, %v833_v39  ;;  %v479_v50 = vmul.f32 %v447_v35, %v1067_v21  ;;  %v165_v59 = vrot.slane %v164_v43, 1  ;;  %v177_v25 = vrot.slane %v176_v52, 2  ;;  %v71_v35 = vld [vmem:[#allocation2 + $0x70] sm:$0xf] }
  0x6d   :  { %v837_v53 = vpop.eup %836  ;;  %v450_v54 = vadd.f32 1.0, %v835_v48  ;;  %v480_v55 = vmul.f32 %v448_v40, %v1069_v22  ;;  %v569_v18 = vsel %vm548_vm1, %v478_v41, %v477_v36  ;;  %v159_v56 = vadd.f32 %v158_v42, %v157_v27 }
  0x6e   :  { %v451_v57 = vadd.f32 1.0, %v837_v53  ;;  %v481_v58 = vmul.f32 %v449_v49, %v1071_v26  ;;  %v570_v47 = vsel %vm550_vm2, %v479_v50, %v569_v18  ;;  %v839_v60 = vpop.eup %838  ;;  %v171_v61 = vadd.f32 %v170_v51, %v169_v29 }
  0x6f   :  { %v482_v30 = vmul.f32 %v450_v54, %v1073_v33  ;;  %v571_v21 = vsel %vm552_vm3, %v480_v55, %v570_v47  ;;  %v452_v62 = vadd.f32 1.0, %v839_v60  ;;  %v166_v0 = vadd.f32 %v165_v59, %v164_v43  ;;  %v73_v47 = vld [vmem:[#allocation2 + $0x78] sm:$0xf] }
  0x70   :  { %v483_v23 = vmul.f32 %v451_v57, %v1076_v44  ;;  %v572_v22 = vsel %vm554_vm4, %v481_v58, %v571_v21  ;;  %v172_v2 = vrot.slane %v171_v61, 1  ;;  %v178_v26 = vadd.f32 %v177_v25, %v176_v52  ;;  %v72_v58 = vld [vmem:[#allocation2 + $0x74] sm:$0xf] }
  0x71   :  { %v573_v1 = vsel %vm556_vm5, %v482_v30, %v572_v22  ;;  %v182_v31 = vrot.slane %v181_v13, 4  ;;  %v484_v3 = vmul.f32 %v452_v62, %v1082_v63  ;;  %v309_v33 = vmul.f32 0.25, %v138_v24  ;;  %v67_v63 = vld [vmem:[#allocation2 + $0x60] sm:$0xf]  ;;  %v69_v24 = vld [vmem:[#allocation2 + $0x68] sm:$0xf] }
  0x72   :  { %v574_v4 = vsel %vm558_vm6, %v483_v23, %v573_v1  ;;  %v310_v32 = vmul.f32 0.25, %v145_v37  ;;  %v173_v5 = vadd.f32 %v172_v2, %v171_v61  ;;  %v179_v6 = vrot.slane %v178_v26, 1 }
  0x73   :  { %v183_v7 = vadd.f32 %v182_v31, %v181_v13  ;;  %v311_v8 = vmul.f32 0.25, %v152_v38  ;;  %v575_v44 = vsel %vm560_vm7, %v484_v3, %v574_v4  ;;  %v312_v45 = vmul.f32 0.25, %v159_v56 }
  0x74   :  { %v313_v9 = vmul.f32 0.25, %v166_v0  ;;  %v1102_v10 = vmul.f32 0.5, %v309_v33  ;;  %750 = vmatprep.mubr.f32.mxu1 %v575_v44  ;;  %v180_v11 = vadd.f32 %v179_v6, %v178_v26  ;;  %v314_v46 = vmul.f32 0.25, %v173_v5 }
  0x75   :  { %v184_v12 = vrot.slane %v183_v7, 2  ;;  %v1104_v14 = vmul.f32 0.5, %v310_v32  ;;  %v1106_v16 = vmul.f32 0.5, %v311_v8  ;;  %v1108_v17 = vmul.f32 0.5, %v312_v45 }
  0x76   :  { %v1110_v13 = vmul.f32 0.5, %v313_v9  ;;  %v373_v19 = vmul.f32 0.70710677, %v309_v33  ;;  %v315_v27 = vmul.f32 0.25, %v180_v11  ;;  %v1112_v28 = vmul.f32 0.5, %v314_v46 }
  0x77   :  { %v185_v20 = vadd.f32 %v184_v12, %v183_v7  ;;  %v374_v29 = vmul.f32 0.70710677, %v310_v32  ;;  %v375_v36 = vmul.f32 0.70710677, %v311_v8  ;;  %v376_v37 = vmul.f32 0.70710677, %v312_v45 }
  0x78   :  { %v377_v38 = vmul.f32 0.70710677, %v313_v9  ;;  %840 = verf.f32 %v373_v19  ;;  %v1114_v40 = vmul.f32 0.5, %v315_v27  ;;  %v378_v41 = vmul.f32 0.70710677, %v314_v46 }
  0x79   :  { %v186_v39 = vrot.slane %v185_v20, 1  ;;  %v379_v42 = vmul.f32 0.70710677, %v315_v27  ;;  %842 = verf.f32 %v374_v29  ;;  %v244_v43 = vsel %vm75_vm0, %v67_v63, 0.0 }
  0x7a   :  { %v251_v48 = vsel %vm75_vm0, %v68_v15, 0.0  ;;  %v258_v49 = vsel %vm75_vm0, %v69_v24, 0.0  ;;  %844 = verf.f32 %v375_v36  ;;  %v245_v51 = vrot.slane %v244_v43, 4 }
  0x7b   :  { %v187_v50 = vadd.f32 %v186_v39, %v185_v20  ;;  %v252_v52 = vrot.slane %v251_v48, 4  ;;  %846 = verf.f32 %v376_v37  ;;  %v259_v53 = vrot.slane %v258_v49, 4 }
  0x7c   :  { %v265_v54 = vsel %vm75_vm0, %v70_v34, 0.0  ;;  %v272_v55 = vsel %vm75_vm0, %v71_v35, 0.0  ;;  %848 = verf.f32 %v377_v38  ;;  %v246_v56 = vadd.f32 %v245_v51, %v244_v43 }
  0x7d   :  { %v316_v18 = vmul.f32 0.25, %v187_v50  ;;  %v253_v57 = vadd.f32 %v252_v52, %v251_v48  ;;  %850 = verf.f32 %v378_v41  ;;  %v260_v59 = vadd.f32 %v259_v53, %v258_v49  ;;  %v74_v49 = vld [vmem:[#allocation2 + $0x7c] sm:$0xf] }
  0x7e   :  { %v266_v60 = vrot.slane %v265_v54, 4  ;;  %v273_v30 = vrot.slane %v272_v55, 4  ;;  %852 = verf.f32 %v379_v42  ;;  %v247_v25 = vrot.slane %v246_v56, 2 }
  0x7f   :  { %v1121_v21 = vmul.f32 0.5, %v316_v18  ;;  %v380_v61 = vmul.f32 0.70710677, %v316_v18  ;;  %v254_v62 = vrot.slane %v253_v57, 2  ;;  %v261_v23 = vrot.slane %v260_v59, 2 }
  0x80   :  { %v267_v22 = vadd.f32 %v266_v60, %v265_v54  ;;  %v274_v0 = vadd.f32 %v273_v30, %v272_v55  ;;  %v248_v1 = vadd.f32 %v247_v25, %v246_v56  ;;  %v279_v2 = vsel %vm75_vm0, %v72_v58, 0.0 }
  0x81   :  { %854 = verf.f32 %v380_v61  ;;  %v286_v26 = vsel %vm75_vm0, %v73_v47, 0.0  ;;  %v255_v3 = vadd.f32 %v254_v62, %v253_v57  ;;  %v262_v4 = vadd.f32 %v261_v23, %v260_v59 }
  0x82   :  { %v841_v31 = vpop.eup %840  ;;  %v268_v33 = vrot.slane %v267_v22, 2  ;;  %v275_v32 = vrot.slane %v274_v0, 2  ;;  %v249_v6 = vrot.slane %v248_v1, 1  ;;  %v280_v7 = vrot.slane %v279_v2, 4 }
  0x83   :  { %v437_v5 = vadd.f32 1.0, %v841_v31  ;;  %v287_v8 = vrot.slane %v286_v26, 4  ;;  %v843_v44 = vpop.eup %842  ;;  %v256_v45 = vrot.slane %v255_v3, 1  ;;  %v263_v9 = vrot.slane %v262_v4, 1 }
  0x84   :  { %v269_v11 = vadd.f32 %v268_v33, %v267_v22  ;;  %v276_v12 = vadd.f32 %v275_v32, %v274_v0  ;;  %v845_v46 = vpop.eup %844  ;;  %v438_v63 = vadd.f32 1.0, %v843_v44  ;;  %v250_v24 = vadd.f32 %v249_v6, %v248_v1 }
  0x85   :  { %v469_v15 = vmul.f32 %v437_v5, %v1102_v10  ;;  %v281_v19 = vadd.f32 %v280_v7, %v279_v2  ;;  %v847_v20 = vpop.eup %846  ;;  %v439_v27 = vadd.f32 1.0, %v845_v46  ;;  %v257_v29 = vadd.f32 %v256_v45, %v255_v3 }
  0x86   :  { %v264_v34 = vadd.f32 %v263_v9, %v262_v4  ;;  %v270_v35 = vrot.slane %v269_v11, 1  ;;  %v849_v36 = vpop.eup %848  ;;  %v440_v37 = vadd.f32 1.0, %v847_v20  ;;  %v470_v38 = vmul.f32 %v438_v63, %v1104_v14 }
  0x87   :  { %v277_v39 = vrot.slane %v276_v12, 1  ;;  %v282_v41 = vrot.slane %v281_v19, 2  ;;  %v851_v42 = vpop.eup %850  ;;  %v441_v43 = vadd.f32 1.0, %v849_v36  ;;  %v471_v48 = vmul.f32 %v439_v27, %v1106_v16 }
  0x88   :  { %v271_v50 = vadd.f32 %v270_v35, %v269_v11  ;;  %v288_v10 = vadd.f32 %v287_v8, %v286_v26  ;;  %v853_v51 = vpop.eup %852  ;;  %v442_v52 = vadd.f32 1.0, %v851_v42  ;;  %v472_v53 = vmul.f32 %v440_v37, %v1108_v17 }
  0x89   :  { %v562_v54 = vsel %vm548_vm1, %v470_v38, %v469_v15  ;;  %v278_v55 = vadd.f32 %v277_v39, %v276_v12  ;;  %v443_v18 = vadd.f32 1.0, %v853_v51  ;;  %v473_v56 = vmul.f32 %v441_v43, %v1110_v13 }
  0x8a   :  { %v563_v14 = vsel %vm550_vm2, %v471_v48, %v562_v54  ;;  %v283_v57 = vadd.f32 %v282_v41, %v281_v19  ;;  %v474_v47 = vmul.f32 %v442_v52, %v1112_v28  ;;  %v289_v59 = vrot.slane %v288_v10, 2 }
  0x8b   :  { %v855_v58 = vpop.eup %854  ;;  %v564_v16 = vsel %vm552_vm3, %v472_v53, %v563_v14  ;;  %v293_v60 = vsel %vm75_vm0, %v74_v49, 0.0  ;;  %v475_v17 = vmul.f32 %v443_v18, %v1114_v40  ;;  %v325_v1 = vmul.f32 0.25, %v250_v24 }
  0x8c   :  { %v444_v30 = vadd.f32 1.0, %v855_v58  ;;  %v565_v61 = vsel %vm554_vm4, %v473_v56, %v564_v16  ;;  %v284_v25 = vrot.slane %v283_v57, 1  ;;  %v290_v13 = vadd.f32 %v289_v59, %v288_v10 }
  0x8d   :  { %v566_v62 = vsel %vm556_vm5, %v474_v47, %v565_v61  ;;  %v294_v23 = vrot.slane %v293_v60, 4  ;;  %v326_v31 = vmul.f32 0.25, %v257_v29  ;;  %v327_v3 = vmul.f32 0.25, %v264_v34 }
  0x8e   :  { %v476_v22 = vmul.f32 %v444_v30, %v1121_v21  ;;  %v567_v0 = vsel %vm558_vm6, %v475_v17, %v566_v62  ;;  %v285_v28 = vadd.f32 %v284_v25, %v283_v57  ;;  %v291_v2 = vrot.slane %v290_v13, 1 }
  0x8f   :  { %v295_v26 = vadd.f32 %v294_v23, %v293_v60  ;;  %v328_v40 = vmul.f32 0.25, %v271_v50  ;;  %v329_v33 = vmul.f32 0.25, %v278_v55  ;;  %v389_v7 = vmul.f32 0.70710677, %v325_v1 }
  0x90   :  { %v568_v4 = vsel %vm560_vm7, %v476_v22, %v567_v0  ;;  %v292_v32 = vadd.f32 %v291_v2, %v290_v13  ;;  %v330_v6 = vmul.f32 0.25, %v285_v28  ;;  %v390_v21 = vmul.f32 0.70710677, %v326_v31  ;;  %v694_v28 = vld [vmem:[%s1168_s2] ss:$0 sm:$0xff] }
  0x91   :  { %748 = vmatmul.mubr.f32.vlgmr.msra.gmra.mrb[0].mxu0 %v568_v4  ;;  %v296_v5 = vrot.slane %v295_v26, 2  ;;  %v391_v45 = vmul.f32 0.70710677, %v327_v3  ;;  %v392_v9 = vmul.f32 0.70710677, %v328_v40  ;;  %856 = verf.f32 %v389_v7 }
  0x92   :  { %v331_v44 = vmul.f32 0.25, %v292_v32  ;;  %v393_v11 = vmul.f32 0.70710677, %v329_v33  ;;  %v394_v46 = vmul.f32 0.70710677, %v330_v6  ;;  %858 = verf.f32 %v390_v21 }
  0x93   :  { %v297_v8 = vadd.f32 %v296_v5, %v295_v26  ;;  %860 = verf.f32 %v391_v45  ;;  %v357_v20 = vmul.f32 0.5, %v325_v1  ;;  %v358_v29 = vmul.f32 0.5, %v326_v31 }
  0x94   :  { %v395_v63 = vmul.f32 0.70710677, %v331_v44  ;;  %862 = verf.f32 %v392_v9  ;;  %v359_v35 = vmul.f32 0.5, %v327_v3  ;;  %v360_v38 = vmul.f32 0.5, %v328_v40 }
  0x95   :  { %v298_v12 = vrot.slane %v297_v8, 1  ;;  %864 = verf.f32 %v393_v11  ;;  %v361_v42 = vmul.f32 0.5, %v329_v33  ;;  %v362_v50 = vmul.f32 0.5, %v330_v6 }
  0x96   :  { %866 = verf.f32 %v394_v46  ;;  %v363_v53 = vmul.f32 0.5, %v331_v44 }
  0x97   :  { %v299_v15 = vadd.f32 %v298_v12, %v297_v8  ;;  %868 = verf.f32 %v395_v63 }
  0x99   :  { %v332_v24 = vmul.f32 0.25, %v299_v15 }
  0x9b   :  { %v396_v19 = vmul.f32 0.70710677, %v332_v24  ;;  %v857_v27 = vpop.eup %856  ;;  %v364_v59 = vmul.f32 0.5, %v332_v24 }
  0x9c   :  { %v859_v34 = vpop.eup %858  ;;  %v453_v36 = vadd.f32 1.0, %v857_v27 }
  0x9d   :  { %870 = verf.f32 %v396_v19  ;;  %v861_v37 = vpop.eup %860  ;;  %v454_v39 = vadd.f32 1.0, %v859_v34 }
  0x9e   :  { %v863_v41 = vpop.eup %862  ;;  %v455_v43 = vadd.f32 1.0, %v861_v37  ;;  %v485_v48 = vmul.f32 %v453_v36, %v357_v20 }
  0x9f   :  { %v865_v49 = vpop.eup %864  ;;  %v456_v10 = vadd.f32 1.0, %v863_v41  ;;  %v486_v51 = vmul.f32 %v454_v39, %v358_v29 }
  0xa0   :  { %v867_v52 = vpop.eup %866  ;;  %v457_v54 = vadd.f32 1.0, %v865_v49  ;;  %v487_v55 = vmul.f32 %v455_v43, %v359_v35 }
  0xa1   :  { %v869_v18 = vpop.eup %868  ;;  %v458_v56 = vadd.f32 1.0, %v867_v52  ;;  %v488_v14 = vmul.f32 %v456_v10, %v360_v38  ;;  %v576_v57 = vsel %vm548_vm1, %v486_v51, %v485_v48 }
  0xa2   :  { %v459_v58 = vadd.f32 1.0, %v869_v18  ;;  %v489_v47 = vmul.f32 %v457_v54, %v361_v42  ;;  %v577_v16 = vsel %vm550_vm2, %v487_v55, %v576_v57 }
  0xa3   :  { %v490_v60 = vmul.f32 %v458_v56, %v362_v50  ;;  %v578_v30 = vsel %vm552_vm3, %v488_v14, %v577_v16 }
  0xa4   :  { %v491_v61 = vmul.f32 %v459_v58, %v363_v53  ;;  %v579_v25 = vsel %vm554_vm4, %v489_v47, %v578_v30 }
  0xa5   :  { %v580_v13 = vsel %vm556_vm5, %v490_v60, %v579_v25 }
  0xa6   :  { %v581_v23 = vsel %vm558_vm6, %v491_v61, %v580_v13 }
  0xa7   :  { %v871_v17 = vpop.eup %870 }
  0xa8   :  { %v460_v62 = vadd.f32 1.0, %v871_v17 }
  0xaa   :  { %v492_v22 = vmul.f32 %v460_v62, %v364_v59 }
  0xac   :  { %v582_v0 = vsel %vm560_vm7, %v492_v22, %v581_v23 }
  0xad   :  { %751 = vmatmul.mubr.f32.vlgmr.msra.gmra.mrb[0].mxu1 %v582_v0 }
 0x164   :  { %v749_v1 = vpop.f32.mrb[0].mxu0 }
 0x165   :  { %v659_v2 = vadd.f32 %v749_v1, %v694_v28  ;;  %v653_v26 = vpop.f32.mrb[1].mxu0 }
 0x166   :  { %v654_v31 = vadd.f32 %v694_v28, %v653_v26 }
 0x167   :  { %673 = vst [vmem:[#allocation7 + $0x8] sm:$0xff] %v659_v2 }
 0x168   :  { %672 = vst [vmem:[#allocation7] sm:$0xff] %v654_v31 }
 0x180   :  { %v752_v3 = vpop.f32.mrb[0].mxu1 }
 0x181   :  { %v669_v4 = vadd.f32 %v752_v3, %v694_v28  ;;  %v663_v40 = vpop.f32.mrb[1].mxu1 }
 0x182   :  { %v664_v33 = vadd.f32 %v694_v28, %v663_v40 }
 0x183   :  { %675 = vst [vmem:[#allocation7 + $0x18] sm:$0xff] %v669_v4 }
 0x184   :  { %674 = vst [vmem:[#allocation7 + $0x10] sm:$0xff] %v664_v33 }
 0x185   :  { %927 = shalt.err (!%p924_p6)
}
 0x186   :  { %s928_s17 = scalar_lea.hbm %s1169_s3, 512 }
 0x187   :  { %p929_p7 = scmp.ne.s32.totalorder %s1169_s3, %s928_s17  ;;  %p932_p8 = scmp.lt.u32.totalorder %s928_s17, %s1169_s3 }
 0x189   :  { %p934_p9 = pnand %p932_p8, %p929_p7 }
 0x18b   :  { %937 = shalt.err (!%p934_p9)
}
 0x18c   :  { %687 = dma.vmem_to_hbm [thread:$0]  %s682_s14, 512, %s1169_s3, [#allocation4], %s948_s0, %s948_s0, %s949_s9  }
 0x18d   :  { %942 = dma.done.wait [#allocation4], 512  }
 0x18e   :  { %943 = vsyncadd [#allocation4], 4294966784 }
 0x18f   :  { %691 = vsyncpa [#allocation3], 1 }
 0x190   :  { %692 = vsyncpa [#allocation6], 1 }
 0x191   :  { %693 = vsyncpa [#allocation4], 1 }

</bundles_post_ra>
